<compile_context>
chip_gen: v7x
topology: tpu7x:2x2x1
jax: 0.10.0
libtpu: 0.0.40
codegen_flags: <defaults>
</compile_context>

<pallas_src>
import jax
import jax.numpy as jnp
from jax.experimental import pallas as pl
from jax.experimental.pallas import tpu as pltpu


def _upsample_kernel(x_ref, hs_ref, wc_ref, ws_ref, b_ref, o_ref):
    # x_ref : (1, TL, C)      compute dtype (bf16 by default)
    # hs_ref: (1, 1, 2, 2C)   f32, precomputed halo rows @ [W3 | W0]
    # wc_ref: (C, 2C) = [W1 | W2]   (contribution of x[m] to its own even|odd outputs)
    # ws_ref: (C, 2C) = [W3 | W0]   (contribution of x[m] to its neighbours' even|odd)
    # b_ref : (1, 2C) f32  (= [b | b])
    # o_ref : (1, TL, 2C) out dtype  ->  [y_even | y_odd] per row
    x = x_ref[0]                      # (TL, C)
    hs = hs_ref[0, 0]                 # (2, 2C) f32
    wc = wc_ref[...]                  # (C, 2C)
    ws = ws_ref[...]                  # (C, 2C)
    b = b_ref[...]                    # (1, 2C) f32

    TL = x.shape[0]
    C2 = wc.shape[1]
    C = C2 // 2

    # Two fused wide matmuls, f32 accumulation on the MXU.
    cur = jnp.dot(x, wc, preferred_element_type=jnp.float32)   # (TL, 2C): [x@W1 | x@W2]
    sh = jnp.dot(x, ws, preferred_element_type=jnp.float32)    # (TL, 2C): [x@W3 | x@W0]

    # Even outputs need sh[m-1, :C]; odd outputs need sh[m+1, C:].
    # Shift on the matmul *output* via XLU roll (half-width to halve the temporaries).
    ev = cur[:, :C] + pltpu.roll(sh[:, :C], 1, 0) + b[:, :C]        # (TL, C)
    od = cur[:, C:] + pltpu.roll(sh[:, C:], TL - 1, 0) + b[:, C:]   # (TL, C)

    o_ref[0, :, :C] = ev.astype(o_ref.dtype)
    o_ref[0, :, C:] = od.astype(o_ref.dtype)

    # Boundary rows: the roll wrapped garbage into row 0 (even) / row TL-1 (odd);
    # patch those single rows with the precomputed halo contributions.
    o_ref[0, 0:1, :C] = (cur[0:1, :C] + hs[0:1, :C] + b[:, :C]).astype(o_ref.dtype)
    o_ref[0, TL - 1:TL, C:] = (
        cur[TL - 1:TL, C:] + hs[1:2, C:] + b[:, C:]).astype(o_ref.dtype)


def _choose_tile_l(L, C, N):
    # Target ~256K input elements per block (bf16 block ~512 KiB, out block ~1 MiB bf16)
    # -> ~85%+ of HBM roofline per the measured tile-size curve, while the in-kernel f32
    # temporaries + double-buffered I/O stay well under the v7x scoped-VMEM budget.
    target_elems = 1 << 18
    cap = (target_elems // max(C, 1)) // 16 * 16
    cap = max(16, min(2048, cap))
    if L <= cap:
        tl = L
    else:
        # Prefer a multiple of 16 that divides L exactly (avoids the padded-tail copy).
        tl = 0
        d = cap
        while d >= 16:
            if L % d == 0:
                tl = d
                break
            d -= 16
        if tl == 0:
            tl = cap
    # v7x megacore: keep >= 2 grid steps when N == 1 so both TensorCores get work.
    if N == 1 and tl >= L and L >= 32:
        tl = ((-(-L // 2)) + 15) // 16 * 16
    return tl


def upsample_pallas_nlc(x_nlc, weight, bias, *, tile_l=None,
                        compute_dtype=jnp.bfloat16, out_dtype=None):
    """x_nlc: (N, L, C); weight: (C_in, C_out, 4) PyTorch layout; bias: (C_out,).

    Returns (N, 2L, C) in out_dtype (defaults to compute_dtype).
    """
    N, L, C = x_nlc.shape
    if out_dtype is None:
        out_dtype = compute_dtype

    # Fused weight matrices / doubled bias (host-side, tiny).
    w = weight.astype(jnp.float32)
    w_cur = jnp.concatenate([w[:, :, 1], w[:, :, 2]], axis=1).astype(compute_dtype)  # (C, 2C)
    w_sh = jnp.concatenate([w[:, :, 3], w[:, :, 0]], axis=1).astype(compute_dtype)   # (C, 2C)
    b2 = jnp.concatenate([bias, bias]).reshape(1, 2 * C).astype(jnp.float32)          # (1, 2C)

    if tile_l is None:
        TL = _choose_tile_l(L, C, N)
    else:
        assert tile_l >= 2, "tile_l must be >= 2 (roll boundary logic needs 2 rows)"
        assert tile_l % 8 == 0 or tile_l >= L, \
            "tile_l must be a multiple of 8 (sublane) or cover the whole L"
        TL = tile_l
    nt = -(-L // TL)             # cdiv
    Lp = nt * TL

    x_p = x_nlc.astype(compute_dtype)
    if Lp != L:
        # Ragged tail: pad with zeros (zero rows contribute nothing and are sliced off).
        x_p = jnp.pad(x_p, ((0, 0), (0, Lp - L), (0, 0)))

    # Halo rows per tile: [x[t*TL - 1], x[(t+1)*TL]] with zeros past the ends.
    # Built from strided slices (no full padded copy of x).
    zrow = jnp.zeros((N, 1, C), compute_dtype)
    if nt > 1:
        prev_rows = x_p[:, TL - 1:Lp - 1:TL, :]                  # (N, nt-1, C)
        next_rows = x_p[:, TL:Lp:TL, :]                          # (N, nt-1, C)
        halo_prev = jnp.concatenate([zrow, prev_rows], axis=1)   # (N, nt, C)
        halo_next = jnp.concatenate([next_rows, zrow], axis=1)   # (N, nt, C)
    else:
        halo_prev = zrow
        halo_next = zrow
    halo = jnp.stack([halo_prev, halo_next], axis=2)             # (N, nt, 2, C)

    # Hoist the tiny halo matmul out of the kernel: one batched XLA matmul.
    hs = jnp.einsum('ntkc,cd->ntkd', halo, w_sh,
                    preferred_element_type=jnp.float32)          # (N, nt, 2, 2C) f32

    out = pl.pallas_call(
        _upsample_kernel,
        out_shape=jax.ShapeDtypeStruct((N, Lp, 2 * C), out_dtype),
        grid_spec=pltpu.PrefetchScalarGridSpec(
            num_scalar_prefetch=0,
            grid=(N, nt),
            in_specs=[
                pl.BlockSpec((1, TL, C), lambda n, t: (n, t, 0)),
                pl.BlockSpec((1, 1, 2, 2 * C), lambda n, t: (n, t, 0, 0)),
                pl.BlockSpec((C, 2 * C), lambda n, t: (0, 0)),
                pl.BlockSpec((C, 2 * C), lambda n, t: (0, 0)),
                pl.BlockSpec((1, 2 * C), lambda n, t: (0, 0)),
            ],
            out_specs=pl.BlockSpec((1, TL, 2 * C), lambda n, t: (n, t, 0)),
        ),
        compiler_params=pltpu.CompilerParams(
            dimension_semantics=("parallel", "parallel"),
            vmem_limit_bytes=64 * 1024 * 1024),
    )(x_p, hs, w_cur, w_sh, b2)

    # (N, Lp, [even|odd]) -> (N, 2Lp, C): row-major reshape interleaves even/odd for free.
    y = out.reshape(N, 2 * Lp, C)
    if Lp != L:
        y = y[:, :2 * L, :]
    return y


def upsample_pallas(x_ncl, weight, bias, *, tile_l=None,
                    compute_dtype=jnp.bfloat16, out_dtype=None):
    """PyTorch-layout entry: x_ncl (N, C, L) -> (N, C, 2L), matches
    nn.ConvTranspose1d(C, C, 4, stride=2, padding=1)."""
    N, C, L = x_ncl.shape
    # Cast is fused before the transpose so the transpose moves compute_dtype bytes.
    x_nlc = jnp.transpose(x_ncl.astype(compute_dtype), (0, 2, 1))    # (N, L, C)
    y_nlc = upsample_pallas_nlc(x_nlc, weight, bias, tile_l=tile_l,
                                compute_dtype=compute_dtype, out_dtype=out_dtype)
    return jnp.transpose(y_nlc, (0, 2, 1))                           # (N, C, 2L)


def _reference_conv_transpose1d(x, w, b, stride=2, padding=1):
    # Pure NumPy reference. x: (N, C_in, L), w: (C_in, C_out, K), b: (C_out,)
    import numpy as np
    x = np.asarray(x, np.float32)
    w = np.asarray(w, np.float32)
    b = np.asarray(b, np.float32)
    N, Cin, L = x.shape
    Cout, K = w.shape[1], w.shape[2]
    L_out = (L - 1) * stride - 2 * padding + K
    y = np.zeros((N, Cout, L_out), np.float32)
    for l in range(L):
        for k in range(K):
            t = l * stride - padding + k
            if 0 <= t < L_out:
                y[:, :, t] += np.einsum('ni,io->no', x[:, :, l], w[:, :, k])
    return y + b[None, :, None]


if __name__ == "__main__":
    import numpy as np

    key = jax.random.PRNGKey(0)
    kx, kw, kb, kx2, kx3 = jax.random.split(key, 5)

    N, C, L = 2, 4, 16
    x = jax.random.normal(kx, (N, C, L), jnp.float32)
    weight = jax.random.normal(kw, (C, C, 4), jnp.float32) * 0.1     # (C_in, C_out, K)
    bias = jax.random.normal(kb, (C,), jnp.float32) * 0.1

    y_ref = _reference_conv_transpose1d(x, weight, bias)

    # Default path: bf16 compute + bf16 output, single L tile.
    y = jax.block_until_ready(upsample_pallas(x, weight, bias))
    assert y.shape == (N, C, 2 * L), y.shape
    y_np = np.asarray(y.astype(jnp.float32))
    assert np.allclose(y_np, y_ref, atol=5e-2, rtol=5e-2), \
        float(np.max(np.abs(y_np - y_ref)))

    # f32 compute path: exact check of the decomposition (parity with PyTorch f32).
    y32 = jax.block_until_ready(
        upsample_pallas(x, weight, bias, compute_dtype=jnp.float32))
    assert np.allclose(np.asarray(y32), y_ref, atol=1e-5, rtol=1e-5), \
        float(np.max(np.abs(np.asarray(y32) - y_ref)))

    # Tiled-L path (grid=(N, 3)) exercising the halo / roll boundary handling.
    L2 = 48
    x2 = jax.random.normal(kx2, (N, C, L2), jnp.float32)
    y2_ref = _reference_conv_transpose1d(x2, weight, bias)
    y2 = jax.block_until_ready(
        upsample_pallas(x2, weight, bias, tile_l=16, compute_dtype=jnp.float32))
    assert y2.shape == (N, C, 2 * L2), y2.shape
    assert np.allclose(np.asarray(y2), y2_ref, atol=1e-4, rtol=1e-4), \
        float(np.max(np.abs(np.asarray(y2) - y2_ref)))

    # Ragged tail path: TL does not divide L (padded last tile is sliced off).
    L3 = 40
    x3 = jax.random.normal(kx3, (N, C, L3), jnp.float32)
    y3_ref = _reference_conv_transpose1d(x3, weight, bias)
    y3 = jax.block_until_ready(
        upsample_pallas(x3, weight, bias, tile_l=16, compute_dtype=jnp.float32))
    assert y3.shape == (N, C, 2 * L3), y3.shape
    assert np.allclose(np.asarray(y3), y3_ref, atol=1e-4, rtol=1e-4), \
        float(np.max(np.abs(np.asarray(y3) - y3_ref)))

    print("KERNEL_OK")
</pallas_src>

<mosaic_0001>
module attributes {stable_mosaic.version = 11 : i64} {
  func.func @_upsample_kernel(%arg0: i32, %arg1: i32, %arg2: memref<1x16x4xbf16, #tpu.memory_space<vmem>>, %arg3: memref<1x1x2x8xf32, #tpu.memory_space<vmem>>, %arg4: memref<4x8xbf16, #tpu.memory_space<vmem>>, %arg5: memref<4x8xbf16, #tpu.memory_space<vmem>>, %arg6: memref<1x8xf32, #tpu.memory_space<vmem>>, %arg7: memref<1x16x8xbf16, #tpu.memory_space<vmem>>) attributes {dimension_semantics = [#tpu.dimension_semantics<parallel>, #tpu.dimension_semantics<parallel>], iteration_bounds = array<i64: 2, 1>, scalar_prefetch = 0 : i64, scratch_operands = 0 : i64, tpu.core_type = #tpu.core_type<tc>, window_params = [{transform_indices = @transform_0, window_bounds = array<i64: 1, 16, 4>}, {transform_indices = @transform_1, window_bounds = array<i64: 1, 1, 2, 8>}, {pipeline_mode = #tpu.pipeline_mode<synchronous>, transform_indices = @transform_2, window_bounds = array<i64: 4, 8>}, {pipeline_mode = #tpu.pipeline_mode<synchronous>, transform_indices = @transform_3, window_bounds = array<i64: 4, 8>}, {pipeline_mode = #tpu.pipeline_mode<synchronous>, transform_indices = @transform_4, window_bounds = array<i64: 1, 8>}, {transform_indices = @transform_5, window_bounds = array<i64: 1, 16, 8>}]} {
    %c0 = arith.constant 0 : index
    %c0_0 = arith.constant 0 : index
    %c0_1 = arith.constant 0 : index
    %0 = vector.load %arg2[%c0, %c0_0, %c0_1] : memref<1x16x4xbf16, #tpu.memory_space<vmem>>, vector<1x16x4xbf16>
    %1 = vector.shape_cast %0 : vector<1x16x4xbf16> to vector<16x4xbf16>
    %c0_2 = arith.constant 0 : index
    %c0_3 = arith.constant 0 : index
    %c0_4 = arith.constant 0 : index
    %c0_5 = arith.constant 0 : index
    %2 = vector.load %arg3[%c0_2, %c0_3, %c0_4, %c0_5] : memref<1x1x2x8xf32, #tpu.memory_space<vmem>>, vector<1x1x2x8xf32>
    %3 = vector.shape_cast %2 : vector<1x1x2x8xf32> to vector<2x8xf32>
    %c0_6 = arith.constant 0 : index
    %c0_7 = arith.constant 0 : index
    %4 = vector.load %arg4[%c0_6, %c0_7] : memref<4x8xbf16, #tpu.memory_space<vmem>>, vector<4x8xbf16>
    %c0_8 = arith.constant 0 : index
    %c0_9 = arith.constant 0 : index
    %5 = vector.load %arg5[%c0_8, %c0_9] : memref<4x8xbf16, #tpu.memory_space<vmem>>, vector<4x8xbf16>
    %c0_10 = arith.constant 0 : index
    %c0_11 = arith.constant 0 : index
    %6 = vector.load %arg6[%c0_10, %c0_11] : memref<1x8xf32, #tpu.memory_space<vmem>>, vector<1x8xf32>
    %cst = arith.constant dense<0.000000e+00> : vector<16x8xf32>
    %7 = tpu.matmul %1, %4, %cst {dimension_numbers = #tpu.dot_dimension_numbers<[1], [0], [0], [1], [0, 0, 1, 1], [], []>} : vector<16x4xbf16>, vector<4x8xbf16>, vector<16x8xf32> -> vector<16x8xf32>
    %cst_12 = arith.constant dense<0.000000e+00> : vector<16x8xf32>
    %8 = tpu.matmul %1, %5, %cst_12 {dimension_numbers = #tpu.dot_dimension_numbers<[1], [0], [0], [1], [0, 0, 1, 1], [], []>} : vector<16x4xbf16>, vector<4x8xbf16>, vector<16x8xf32> -> vector<16x8xf32>
    %9 = vector.extract_strided_slice %7 {offsets = [0, 0], sizes = [16, 4], strides = [1, 1]} : vector<16x8xf32> to vector<16x4xf32>
    %10 = vector.extract_strided_slice %8 {offsets = [0, 0], sizes = [16, 4], strides = [1, 1]} : vector<16x8xf32> to vector<16x4xf32>
    %c1_i32 = arith.constant 1 : i32
    %11 = tpu.dynamic_rotate %10 by %c1_i32 dim 0 : vector<16x4xf32>, i32 -> vector<16x4xf32>
    %12 = arith.addf %9, %11 : vector<16x4xf32>
    %13 = vector.extract_strided_slice %6 {offsets = [0, 0], sizes = [1, 4], strides = [1, 1]} : vector<1x8xf32> to vector<1x4xf32>
    %14 = vector.broadcast %13 : vector<1x4xf32> to vector<16x4xf32>
    %15 = arith.addf %12, %14 : vector<16x4xf32>
    %16 = vector.extract_strided_slice %7 {offsets = [0, 4], sizes = [16, 4], strides = [1, 1]} : vector<16x8xf32> to vector<16x4xf32>
    %17 = vector.extract_strided_slice %8 {offsets = [0, 4], sizes = [16, 4], strides = [1, 1]} : vector<16x8xf32> to vector<16x4xf32>
    %c15_i32 = arith.constant 15 : i32
    %18 = tpu.dynamic_rotate %17 by %c15_i32 dim 0 : vector<16x4xf32>, i32 -> vector<16x4xf32>
    %19 = arith.addf %16, %18 : vector<16x4xf32>
    %20 = vector.extract_strided_slice %6 {offsets = [0, 4], sizes = [1, 4], strides = [1, 1]} : vector<1x8xf32> to vector<1x4xf32>
    %21 = vector.broadcast %20 : vector<1x4xf32> to vector<16x4xf32>
    %22 = arith.addf %19, %21 : vector<16x4xf32>
    %23 = arith.truncf %15 : vector<16x4xf32> to vector<16x4xbf16>
    %c0_13 = arith.constant 0 : index
    %c0_14 = arith.constant 0 : index
    %c0_15 = arith.constant 0 : index
    %24 = vector.load %arg7[%c0_13, %c0_14, %c0_15] : memref<1x16x8xbf16, #tpu.memory_space<vmem>>, vector<1x16x4xbf16>
    %25 = vector.shape_cast %24 : vector<1x16x4xbf16> to vector<16x4xbf16>
    %26 = vector.shape_cast %23 : vector<16x4xbf16> to vector<1x16x4xbf16>
    tpu.vector_store %arg7[%c0_13, %c0_14, %c0_15], %26 {strides = array<i32>} : memref<1x16x8xbf16, #tpu.memory_space<vmem>>, vector<1x16x4xbf16>,
    %27 = arith.truncf %22 : vector<16x4xf32> to vector<16x4xbf16>
    %c0_16 = arith.constant 0 : index
    %c0_17 = arith.constant 0 : index
    %c4 = arith.constant 4 : index
    %28 = vector.load %arg7[%c0_16, %c0_17, %c4] : memref<1x16x8xbf16, #tpu.memory_space<vmem>>, vector<1x16x4xbf16>
    %29 = vector.shape_cast %28 : vector<1x16x4xbf16> to vector<16x4xbf16>
    %30 = vector.shape_cast %27 : vector<16x4xbf16> to vector<1x16x4xbf16>
    tpu.vector_store %arg7[%c0_16, %c0_17, %c4], %30 {strides = array<i32>} : memref<1x16x8xbf16, #tpu.memory_space<vmem>>, vector<1x16x4xbf16>,
    %31 = vector.extract_strided_slice %7 {offsets = [0, 0], sizes = [1, 4], strides = [1, 1]} : vector<16x8xf32> to vector<1x4xf32>
    %32 = vector.extract_strided_slice %3 {offsets = [0, 0], sizes = [1, 4], strides = [1, 1]} : vector<2x8xf32> to vector<1x4xf32>
    %33 = arith.addf %31, %32 : vector<1x4xf32>
    %34 = vector.extract_strided_slice %6 {offsets = [0, 0], sizes = [1, 4], strides = [1, 1]} : vector<1x8xf32> to vector<1x4xf32>
    %35 = arith.addf %33, %34 : vector<1x4xf32>
    %36 = arith.truncf %35 : vector<1x4xf32> to vector<1x4xbf16>
    %c0_18 = arith.constant 0 : index
    %c0_19 = arith.constant 0 : index
    %c0_20 = arith.constant 0 : index
    %37 = vector.load %arg7[%c0_18, %c0_19, %c0_20] : memref<1x16x8xbf16, #tpu.memory_space<vmem>>, vector<1x1x4xbf16>
    %38 = vector.shape_cast %37 : vector<1x1x4xbf16> to vector<1x4xbf16>
    %39 = vector.shape_cast %36 : vector<1x4xbf16> to vector<1x1x4xbf16>
    tpu.vector_store %arg7[%c0_18, %c0_19, %c0_20], %39 {strides = array<i32>} : memref<1x16x8xbf16, #tpu.memory_space<vmem>>, vector<1x1x4xbf16>,
    %40 = vector.extract_strided_slice %7 {offsets = [15, 4], sizes = [1, 4], strides = [1, 1]} : vector<16x8xf32> to vector<1x4xf32>
    %41 = vector.extract_strided_slice %3 {offsets = [1, 4], sizes = [1, 4], strides = [1, 1]} : vector<2x8xf32> to vector<1x4xf32>
    %42 = arith.addf %40, %41 : vector<1x4xf32>
    %43 = vector.extract_strided_slice %6 {offsets = [0, 4], sizes = [1, 4], strides = [1, 1]} : vector<1x8xf32> to vector<1x4xf32>
    %44 = arith.addf %42, %43 : vector<1x4xf32>
    %45 = arith.truncf %44 : vector<1x4xf32> to vector<1x4xbf16>
    %c0_21 = arith.constant 0 : index
    %c15 = arith.constant 15 : index
    %c4_22 = arith.constant 4 : index
    %46 = vector.load %arg7[%c0_21, %c15, %c4_22] : memref<1x16x8xbf16, #tpu.memory_space<vmem>>, vector<1x1x4xbf16>
    %47 = vector.shape_cast %46 : vector<1x1x4xbf16> to vector<1x4xbf16>
    %48 = vector.shape_cast %45 : vector<1x4xbf16> to vector<1x1x4xbf16>
    tpu.vector_store %arg7[%c0_21, %c15, %c4_22], %48 {strides = array<i32>} : memref<1x16x8xbf16, #tpu.memory_space<vmem>>, vector<1x1x4xbf16>,
    return
  }
  func.func @transform_0(%arg0: i32, %arg1: i32) -> (i32, i32, i32) {
    %c0_i32 = arith.constant 0 : i32
    %c0_i32_0 = arith.constant 0 : i32
    return %arg0, %arg1, %c0_i32 : i32, i32, i32
  }
  func.func @transform_1(%arg0: i32, %arg1: i32) -> (i32, i32, i32, i32) {
    %c0_i32 = arith.constant 0 : i32
    %c0_i32_0 = arith.constant 0 : i32
    %c0_i32_1 = arith.constant 0 : i32
    return %arg0, %arg1, %c0_i32, %c0_i32_0 : i32, i32, i32, i32
  }
  func.func @transform_2(%arg0: i32, %arg1: i32) -> (i32, i32) {
    %c0_i32 = arith.constant 0 : i32
    %c0_i32_0 = arith.constant 0 : i32
    %c0_i32_1 = arith.constant 0 : i32
    return %c0_i32, %c0_i32_0 : i32, i32
  }
  func.func @transform_3(%arg0: i32, %arg1: i32) -> (i32, i32) {
    %c0_i32 = arith.constant 0 : i32
    %c0_i32_0 = arith.constant 0 : i32
    %c0_i32_1 = arith.constant 0 : i32
    return %c0_i32, %c0_i32_0 : i32, i32
  }
  func.func @transform_4(%arg0: i32, %arg1: i32) -> (i32, i32) {
    %c0_i32 = arith.constant 0 : i32
    %c0_i32_0 = arith.constant 0 : i32
    %c0_i32_1 = arith.constant 0 : i32
    return %c0_i32, %c0_i32_0 : i32, i32
  }
  func.func @transform_5(%arg0: i32, %arg1: i32) -> (i32, i32, i32) {
    %c0_i32 = arith.constant 0 : i32
    %c0_i32_0 = arith.constant 0 : i32
    return %arg0, %arg1, %c0_i32 : i32, i32, i32
  }
}

</mosaic_0001>

<bundles_post_ra>
// kernel: tpu_custom_call.1
= control target key start
LH: loop header
LB: loop body
LE: loop exit
PB: predicated region body
PF: predicated region fallthrough
CT: control target
= control target key end

     0   :  { %s1460_s0 = inlined_call_operand.hbm [shape: bf16[2,16,4], index: 0, kind: input, shape index: {}]   ;;  %s1461_s1 = inlined_call_operand.hbm [shape: f32[2,1,2,8], index: 1, kind: input, shape index: {}]   ;;  %s1462_s2 = inlined_call_operand.hbm [shape: bf16[4,8], index: 2, kind: input, shape index: {}]   ;;  %s1463_s3 = inlined_call_operand.hbm [shape: bf16[4,8], index: 3, kind: input, shape index: {}]   ;;  %s1464_s4 = inlined_call_operand.hbm [shape: f32[1,8], index: 4, kind: input, shape index: {}]   ;;  %s1465_s5 = inlined_call_operand.hbm [shape: bf16[2,16,8], index: 5, kind: output, shape index: {}]  }
   0x1   :  { %1471 = sst [smem:[#allocation18_spill]] %s1460_s0 }
   0x2   :  { %1472 = sst [smem:[#allocation19_spill]] %s1462_s2 }
   0x3   :  { %1473 = sst [smem:[#allocation20_spill]] %s1463_s3 }
   0x4   :  { %1474 = sst [smem:[#allocation21_spill]] %s1464_s4 }
   0x5   :  { %10 = vsyncpa [#allocation3], 0 }
   0x6   :  { %12 = vsyncpa [#allocation3 + $0x1], 0 }
   0x7   :  { %13 = vsyncpa [#allocation6], 0 }
   0x8   :  { %15 = vsyncpa [#allocation6 + $0x1], 0 }
   0x9   :  { %16 = vsyncpa [#allocation9], 0 }
   0xa   :  { %17 = vsyncpa [#allocation4], 0 }
   0xb   :  { %19 = vsyncpa [#allocation4 + $0x1], 0  ;;  %s1127_s18 = smov 0   ;;  %s1129_s19 = smov 0  }
   0xc   :  { %s1131_s20 = smov 0   ;;  %s1133_s21 = smov 0  }
   0xd   :  { %s1135_s22 = smov 0   ;;  %s1137_s23 = smov 0  }
   0xe LB: > { %s1158_s24 = sadd.s32 4294967295, %s1082_s23   ;;  %s686_s25 = sadd.s32 4294967294, %s1082_s23   ;;  %s1082_s23 = sphi %s1137_s23, %s25_s23   ;;  %s1078_s22 = sphi %s1135_s22, %s1503_s22   ;;  %s1074_s21 = sphi %s1133_s21, %s1502_s21   ;;  %s1070_s20 = sphi %s1131_s20, %s1501_s20   ;;  %s1066_s19 = sphi %s1129_s19, %s1500_s19   ;;  %s1062_s18 = sphi %s1127_s18, %s1499_s18  }
   0xf   : > { %p59_p0 = scmp.ne.s32.totalorder %s1066_s19, %s1062_s18  ;;  %p1466_p1 = scmp.eq.s32.totalorder %s1158_s24, 0 }
  0x10   : > { %p182_p3 = scmp.eq.s32.totalorder %s686_s25, 1  ;;  %p687_p5 = scmp.ge.s32.totalorder %s1082_s23, 1 }
  0x11   : > { %p1167_p4 = por %p1466_p1, %p59_p0  ;;  %p189_p7 = scmp.lt.s32.totalorder %s1082_s23, 3 }
  0x12   : > { %p1172_p6 = por %p182_p3, %p59_p0  ;;  %s1084_s29 = smov [#allocation7]  }
  0x13   : > { %s1475_s26 = scalar_select %p1167_p4, 1, 0 }
  0x14   : > { %s1476_s27 = scalar_select %p1172_p6, 1, 0 }
  0x15   : > { %p1177_p8 = pnand %p687_p5, %p189_p7  ;;  %s202_s30 = sshll.u32 %s1084_s29, 4  ;;  %s203_s30 = int_to_ptr.vmem [resolvable:$true] %s202_s30 }
  0x16   : > { %s1085_s6 = smov [#allocation8]   ;;  %s1086_s9 = smov [#allocation10]  }
  0x17   : > { %s1477_s28 = scalar_select %p1177_p8, 1, 0 }
  0x18   : > { %p756_p10 = pneg %p1177_p8  ;;  %s213_s7 = sshll.u32 %s1085_s6, 4  ;;  %s1190_s7 = int_to_ptr.vmem [resolvable:$true] %s213_s7 }
  0x19   : > { %s224_s10 = sshll.u32 %s1086_s9, 4  ;;  %s1479_s2 = sld [smem:[#allocation19_spill]]  ;;  %s1192_s10 = int_to_ptr.vmem [resolvable:$true] %s224_s10 }
  0x1a   : > { %p1186_p11 = pnand %p756_p10, %p1466_p1 }
  0x1c   : > { %p1202_p13 = pneg %p1186_p11 }
  0x1f   : > { %s844_s13 = scalar_lea.hbm %s1479_s2, 32 }
  0x20   : > { %p845_p12 = scmp.ne.s32.totalorder %s1479_s2, %s844_s13  ;;  %p851_p5 = scmp.lt.u32.totalorder %s844_s13, %s1479_s2 }
  0x22   : > { %p847_p0 = pnand %p1202_p13, %p845_p12 }
  0x24   : > { %p848_p3 = pneg %p847_p0 }
  0x26   : > { %p853_p7 = pnand %p851_p5, %p848_p3 }
  0x28   : > { %856 = shalt.err (!%p853_p7)
}
  0x29   : > { %s857_s29 = scalar_lea.vmem %s203_s30, 32  ;;  %p865_p2 = scmp.lt.s32.totalorder %s203_s30, %s203_s30 }
  0x2a   : > { %p858_p10 = scmp.ne.s32.totalorder %s203_s30, %s857_s29  ;;  %p866_p6 = scmp.lt.s32.totalorder %s857_s29, %s857_s29 }
  0x2c   : > { %p860_p9 = pnand %p858_p10, %p1202_p13  ;;  %p867_p4 = por %p866_p6, %p865_p2 }
  0x2e   : > { %p861_p1 = pneg %p860_p9 }
  0x30   : > { %p868_p8 = pnand %p867_p4, %p861_p1 }
  0x32   : > { %871 = shalt.err (!%p868_p8)
}
  0x33   : > { %759 = dma.hbm_to_vmem [thread:$0]  (!%p1186_p11), %s1479_s2, 32, %s203_s30, [#allocation6]  }
  0x34   : > { %s1481_s3 = sld [smem:[#allocation20_spill]] }
  0x3a   : > { %s872_s13 = scalar_lea.hbm %s1481_s3, 32 }
  0x3b   : > { %p873_p9 = scmp.ne.s32.totalorder %s1481_s3, %s872_s13  ;;  %p879_p1 = scmp.lt.u32.totalorder %s872_s13, %s1481_s3 }
  0x3d   : > { %p875_p12 = pnand %p873_p9, %p1202_p13 }
  0x3f   : > { %p876_p2 = pneg %p875_p12 }
  0x41   : > { %p881_p4 = pnand %p879_p1, %p876_p2 }
  0x43   : > { %884 = shalt.err (!%p881_p4)
}
  0x44   : > { %s885_s30 = scalar_lea.vmem %s1190_s7, 32  ;;  %p893_p3 = scmp.lt.s32.totalorder %s1190_s7, %s1190_s7 }
  0x45   : > { %p886_p6 = scmp.ne.s32.totalorder %s1190_s7, %s885_s30  ;;  %p894_p5 = scmp.lt.s32.totalorder %s885_s30, %s885_s30 }
  0x47   : > { %p888_p8 = pnand %p886_p6, %p1202_p13  ;;  %p895_p7 = por %p894_p5, %p893_p3 }
  0x49   : > { %p889_p0 = pneg %p888_p8 }
  0x4b   : > { %p896_p10 = pnand %p895_p7, %p889_p0 }
  0x4d   : > { %899 = shalt.err (!%p896_p10)
}
  0x4e   : > { %762 = dma.hbm_to_vmem [thread:$0]  (!%p1186_p11), %s1481_s3, 32, %s1190_s7, [#allocation9]  }
  0x4f   : > { %s1482_s4 = sld [smem:[#allocation21_spill]] }
  0x55   : > { %s900_s12 = scalar_lea.hbm %s1482_s4, 16 }
  0x56   : > { %p901_p9 = scmp.ne.s32.totalorder %s1482_s4, %s900_s12  ;;  %p907_p1 = scmp.lt.u32.totalorder %s900_s12, %s1482_s4 }
  0x58   : > { %p903_p12 = pnand %p901_p9, %p1202_p13 }
  0x5a   : > { %p904_p2 = pneg %p903_p12 }
  0x5c   : > { %p909_p4 = pnand %p907_p1, %p904_p2 }
  0x5e   : > { %912 = shalt.err (!%p909_p4)
}
  0x5f   : > { %s913_s7 = scalar_lea.vmem %s1192_s10, 16  ;;  %s920_s25 = scalar_lea.vmem %s1192_s10, 32 }
  0x60   : > { %p914_p6 = scmp.ne.s32.totalorder %s1192_s10, %s913_s7  ;;  %p921_p3 = scmp.lt.s32.totalorder %s1192_s10, %s1192_s10 }
  0x61   : > { %p922_p5 = scmp.lt.s32.totalorder %s920_s25, %s913_s7 }
  0x62   : > { %p916_p8 = pnand %p914_p6, %p1202_p13 }
  0x63   : > { %p923_p7 = por %p922_p5, %p921_p3 }
  0x64   : > { %p917_p0 = pneg %p916_p8 }
  0x66   : > { %p924_p10 = pnand %p923_p7, %p917_p0 }
  0x68   : > { %927 = shalt.err (!%p924_p10)
}
  0x69   : > { %765 = dma.hbm_to_vmem [thread:$0]  (!%p1186_p11), %s1482_s4, 16, %s1192_s10, [#allocation9]  }
  0x6a   : > { %s46_s16 = sadd.s32 1, %s1070_s20  ;;  %s37_s6 = sadd.s32 1, %s1078_s22 }
  0x6b   : > { %p53_p13 = scmp.ne.s32.totalorder %s1070_s20, %s1066_s19  ;;  %p39_p9 = scmp.ge.s32.totalorder %s37_s6, 2 }
  0x6c   : > { %p54_p12 = scmp.eq.s32.totalorder %s1082_s23, 0  ;;  %p1483_p2 = scmp.eq.s32.totalorder %s1158_s24, 1 }
  0x6d   : > { %p780_p4 = scmp.lt.s32.totalorder %s1082_s23, 2  ;;  %s1505_s6 = smov (%p39_p9, %s37_s6), 0 }
  0x6e   : > { %p1272_p1 = por %p1483_p2, %p53_p13  ;;  %1485 = sst [smem:[#allocation17_spill]] %s1505_s6 }
  0x6f   : > { %p55_p6 = por %p54_p12, %p53_p13  ;;  %s1280_s9 = sand.u32 1, %s1070_s20  }
  0x70   : > { %s1484_s8 = scalar_select %p1272_p1, 1, 0 }
  0x71   : > { %s41_s10 = ssub.s32 %s1078_s22, %s1505_s6  ;;  %s692_s11 = sshll.u32 %s1280_s9, 3 }
  0x72   : > { %p44_p11 = scmp.eq.s32.totalorder %s41_s10, 0  ;;  %s716_s12 = sshll.u32 %s1078_s22, 7 }
  0x73   : > { %s1486_s0 = sld [smem:[#allocation18_spill]]  ;;  %s239_s7 = scalar_lea.vmem [#allocation2], %s692_s11 }
  0x74   : > { %s1287_s13 = scalar_select %p44_p11, %s1070_s20, %s46_s16  }
  0x75   : > { %s248_s25 = sshll.u32 %s239_s7, 4  ;;  %p1298_p8 = pnand %p780_p4, %p55_p6  ;;  %s1294_s25 = int_to_ptr.vmem [resolvable:$true] %s248_s25 }
  0x76   : > { %s236_s16 = scalar_lea.sflag [#allocation3], %s1280_s9 }
  0x77   : > { %p930_p3 = pneg %p1298_p8 }
  0x79   : > { %s1292_s17 = scalar_lea.hbm %s1486_s0, %s716_s12  ;;  %s933_s14 = scalar_lea.hbm %s1486_s0, 256 }
  0x7a   : > { %s928_s10 = scalar_lea.hbm %s1292_s17, 128  ;;  %p934_p10 = scmp.lt.u32.totalorder %s1292_s17, %s1486_s0 }
  0x7b   : > { %p929_p0 = scmp.ne.s32.totalorder %s1292_s17, %s928_s10  ;;  %p935_p13 = scmp.lt.u32.totalorder %s933_s14, %s928_s10 }
  0x7c   : > { %p937_p12 = scmp.lt.u32.totalorder %s928_s10, %s1292_s17 }
  0x7d   : > { %p931_p5 = pnand %p930_p3, %p929_p0  ;;  %p936_p9 = por %p935_p13, %p934_p10 }
  0x7f   : > { %p932_p7 = pneg %p931_p5  ;;  %p938_p2 = por %p937_p12, %p936_p9 }
  0x81   : > { %p939_p4 = pnand %p938_p2, %p932_p7 }
  0x83   : > { %942 = shalt.err (!%p939_p4)
}
  0x84   : > { %s943_s29 = scalar_lea.vmem %s1294_s25, 128  ;;  %s1087_s11 = smov [#allocation2]  }
  0x85   : > { %p944_p6 = scmp.ne.s32.totalorder %s1294_s25, %s943_s29  ;;  %s948_s12 = sshll.u32 %s1087_s11, 4  ;;  %s949_s12 = int_to_ptr.vmem [resolvable:$false] %s948_s12 }
  0x86   : > { %s950_s15 = scalar_lea.vmem %s949_s12, 256  ;;  %p951_p5 = scmp.lt.s32.totalorder %s1294_s25, %s949_s12 }
  0x87   : > { %p946_p11 = pnand %p944_p6, %p930_p3  ;;  %p952_p10 = scmp.lt.s32.totalorder %s950_s15, %s943_s29 }
  0x89   : > { %p947_p0 = pneg %p946_p11  ;;  %p953_p13 = por %p952_p10, %p951_p5 }
  0x8b   : > { %p954_p9 = pnand %p953_p13, %p947_p0 }
  0x8d   : > { %957 = shalt.err (!%p954_p9)
}
  0x8e   : > { %s1088_s10 = smov 64   ;;  %s1089_s14 = smov 4  }
  0x8f   : > { %769 = dma.hbm_to_vmem [thread:$0]  (!%p1298_p8), %s1292_s17, 128, %s1294_s25, %s236_s16, %s1088_s10, %s1088_s10, %s1089_s14  }
  0x90   : > { %s695_s7 = sshll.u32 %s1280_s9, 1  ;;  %s696_s11 = sshll.u32 %s1078_s22, 5 }
  0x91   : > { %s1336_s15 = scalar_lea.hbm %s1461_s1, %s696_s11  ;;  %s262_s0 = scalar_lea.vmem [#allocation5], %s695_s7 }
  0x92   : > { %s270_s2 = sshll.u32 %s262_s0, 4  ;;  %s1488_s3 = sand.u32 1, %s1082_s23   ;;  %s271_s2 = int_to_ptr.vmem [resolvable:$true] %s270_s2 }
  0x93   : > { %s259_s4 = scalar_lea.sflag [#allocation6], %s1488_s3  ;;  %s958_s6 = scalar_lea.hbm %s1336_s15, 32 }
  0x94   : > { %p959_p7 = scmp.ne.s32.totalorder %s1336_s15, %s958_s6  ;;  %s963_s25 = scalar_lea.hbm %s1461_s1, 64 }
  0x95   : > { %p964_p4 = scmp.lt.u32.totalorder %s1336_s15, %s1461_s1  ;;  %p965_p6 = scmp.lt.u32.totalorder %s963_s25, %s958_s6 }
  0x96   : > { %p961_p12 = pnand %p959_p7, %p930_p3  ;;  %p967_p0 = scmp.lt.u32.totalorder %s958_s6, %s1336_s15 }
  0x97   : > { %p966_p11 = por %p965_p6, %p964_p4 }
  0x98   : > { %p962_p2 = pneg %p961_p12 }
  0x99   : > { %p968_p5 = por %p967_p0, %p966_p11 }
  0x9b   : > { %p969_p10 = pnand %p968_p5, %p962_p2 }
  0x9d   : > { %972 = shalt.err (!%p969_p10)
}
  0x9e   : > { %s973_s0 = scalar_lea.vmem %s271_s2, 32  ;;  %s1090_s3 = smov [#allocation5]  }
  0x9f   : > { %p974_p13 = scmp.ne.s32.totalorder %s271_s2, %s973_s0  ;;  %s978_s14 = sshll.u32 %s1090_s3, 4  ;;  %s979_s14 = int_to_ptr.vmem [resolvable:$false] %s978_s14 }
  0xa0   : > { %s980_s7 = scalar_lea.vmem %s979_s14, 64  ;;  %p981_p12 = scmp.lt.s32.totalorder %s271_s2, %s979_s14 }
  0xa1   : > { %p976_p9 = pnand %p974_p13, %p930_p3  ;;  %p982_p1 = scmp.lt.s32.totalorder %s980_s7, %s973_s0 }
  0xa3   : > { %p977_p7 = pneg %p976_p9  ;;  %p983_p4 = por %p982_p1, %p981_p12 }
  0xa5   : > { %p984_p6 = pnand %p983_p4, %p977_p7 }
  0xa7   : > { %987 = shalt.err (!%p984_p6)
}
  0xa8   : > { %772 = dma.hbm_to_vmem [thread:$0]  (!%p1298_p8), %s1336_s15, 32, %s271_s2, %s259_s4  }
  0xa9   : > { %p1489_p2 = scmp.ne.s32.totalorder %s1477_s28, 0 }
  0xaa   : > { %s1362_s6 = sand.u32 (!%p1489_p2), 1, %s1066_s19   ;;  %p1490_p1 = scmp.ne.s32.totalorder (!%p1489_p2), %s1475_s26, 0 }
  0xab   : > { %279 = sbr.rel (%p1489_p2) target bundleno = 678 (0x2a6), region = 40  ;;  %s698_s11 = sshll.u32 (!%p1489_p2), %s1362_s6, 3 }
  0xac   : > { %s282_s12 = scalar_lea.sflag (!%p1489_p2), [#allocation3], %s1362_s6  ;;  %s285_s29 = scalar_lea.vmem (!%p1489_p2), [#allocation2], %s698_s11 }
  0xb2   : > { %1041 = dma.done.wait (%p1490_p1), %s282_s12, 128  }
  0xb3   : > { %1043 = vsyncadd (%p1490_p1), %s282_s12, 4294967168  ;;  %s290_s2 = sand.u32 1, %s1158_s24   ;;  %s699_s4 = sshll.u32 %s1362_s6, 1 }
  0xb4   : > { %s291_s28 = scalar_lea.sflag [#allocation6], %s290_s2  ;;  %s1374_s30 = scalar_lea.vmem [#allocation5], %s699_s4 }
  0xb5   : > { %1045 = dma.done.wait (%p1490_p1), %s291_s28, 32  }
  0xb6   : > { %1047 = vsyncadd (%p1490_p1), %s291_s28, 4294967264  ;;  %p1491_p8 = scmp.eq.s32.totalorder %s1158_s24, 0 }
  0xb8   : > { %1049 = dma.done.wait (%p1491_p8), [#allocation6], 32   ;;  %p1492_p3 = pmov %p1491_p8 }
  0xba   : > { %1051 = vsyncadd (%p1492_p3), [#allocation6], 4294967264  ;;  %p1493_p11 = pmov %p1492_p3 }
  0xbb   : > { %p1494_p0 = pmov %p1492_p3 }
  0xbc   : > { %1053 = dma.done.wait (%p1493_p11), [#allocation9], 48  }
  0xbd   : > { %1055 = vsyncadd (%p1494_p0), [#allocation9], 4294967248  ;;  %v1091_v0 = vmov 0.0   ;;  %vm1092_vm0 = vmmov 0   ;;  %vm356_vm1 = vcmask 1041408   ;;  %v843_v5 = vld [vmem:[%s285_s29] sm:$0xff]   ;;  %v447_v6 = vlaneseq }
  0xbe   : > { %732 = vmatprep.subr.bf16.mxu1 %v1091_v0  ;;  %726 = vmatprep.subr.bf16.mxu0 %v1091_v0  ;;  %v345_v1 = vld [vmem:[#allocation8] sm:$0x3]  ;;  %v344_v2 = vld [vmem:[#allocation7] sm:$0x3]  ;;  %vm352_vm2 = vcmask 31744   ;;  %s1093_s24 = smov 124  }
  0xbf   : > { %734 = vmatprep.mubr.msk.bf16.mxu1 %vm1092_vm0, %v1091_v0  ;;  %728 = vmatprep.mubr.msk.bf16.mxu0 %vm1092_vm0, %v1091_v0  ;;  %v402_v3 = vsel %vm356_vm1, %v345_v1, 0  ;;  %v358_v4 = vsel %vm356_vm1, %v344_v2, 0  ;;  %v448_v7 = vshrl.u32 %v447_v6, 7  ;;  %v346_v12 = vld [vmem:[#allocation10] sm:$0x1]  ;;  %vm495_vm4 = vcmask 27648  }
  0xc0   : > { %733 = vmatpush3.bf16.msra.mxu1 %v402_v3  ;;  %727 = vmatpush3.bf16.msra.mxu0 %v358_v4  ;;  %s1390_s26 = scalar_lea.vmem [#allocation11], %s698_s11  ;;  %s1094_s15 = smov 4   ;;  %v343_v37 = vld [vmem:[%s1374_s30] sm:$0x3]  ;;  %vm506_vm6 = vcmask 60448   ;;  %vm512_vm7 = vcmask 24576  }
  0xc1   : > { %v457_v10 = vsub.s32 0, %v448_v7  ;;  %vm449_vm3 = vcmp.lt.s32.totalorder %v448_v7, 1  ;;  %vm472_vm5 = vcmp.lt.s32.totalorder %v448_v7, 7  ;;  %v519_v41 = vrot.slane %v343_v37, 2  ;;  %s721_s9 = sshll.u32 %s1074_s21, 7  ;;  %s546_s17 = sshll.u32 %s1390_s26, 4  ;;  %s1409_s17 = int_to_ptr.vmem [resolvable:$true] %s546_s17 }
  0xc2   : > { %vm513_vm8 = vsmask.f32 256  ;;  %vm524_vm10 = vcmask 60451   ;;  %vm525_vm11 = vsmask.f32 7950  ;;  %s1406_s10 = scalar_lea.hbm %s1465_s5, %s721_s9  ;;  %s531_s0 = scalar_lea.sflag [#allocation4], %s1362_s6 }
  0xc3   : > { %735 = vmatmul.mubr.msk.bf16.vlgmr.msra.gmra.mrb[0].mxu1 %vm352_vm2, %v843_v5  ;;  %729 = vmatmul.mubr.msk.bf16.vlgmr.msra.gmra.mrb[0].mxu0 %vm352_vm2, %v843_v5  ;;  %v458_v20 = vrot.slane %v346_v12, %v457_v10  ;;  %vm514_vm9 = vmand %vm512_vm7, %vm513_vm8  ;;  %s988_s21 = scalar_lea.vmem %s1409_s17, 128  ;;  %p1495_p10 = scmp.ne.s32.totalorder %s1484_s8, 0 }
  0xc4   : > { %vm526_vm12 = vmand %vm524_vm10, %vm525_vm11  ;;  %p989_p5 = scmp.ne.s32.totalorder %s1409_s17, %s988_s21  ;;  %s1095_s3 = smov [#allocation11]  }
  0xc5   : > { %s992_s14 = sshll.u32 %s1095_s3, 4  ;;  %s993_s14 = int_to_ptr.vmem [resolvable:$false] %s992_s14 }
  0xc6   : > { %p990_p13 = pnand %p989_p5, %p1495_p10  ;;  %s994_s7 = scalar_lea.vmem %s993_s14, 256 }
  0xc7   : > { %p995_p7 = scmp.lt.s32.totalorder %s1409_s17, %s993_s14  ;;  %p996_p12 = scmp.lt.s32.totalorder %s994_s7, %s988_s21 }
  0xc8   : > { %p991_p9 = pneg %p990_p13 }
  0xc9   : > { %p997_p4 = por %p996_p12, %p995_p7 }
  0xcb   : > { %p998_p6 = pnand %p997_p4, %p991_p9 }
 0x196   : > { %v438_v8 = vpop.f32.mrb[0].mxu1  ;;  %v394_v9 = vpop.f32.mrb[0].mxu0 }
 0x197   : > { %464 = vrot.lane.b32.xlu0 %v438_v8, %s1093_s24  ;;  %v736_v11 = vpop.f32.mrb[1].mxu1  ;;  %v730_v13 = vpop.f32.mrb[1].mxu0  ;;  %v445_v16 = vrot.slane %v438_v8, 7  ;;  %v509_v40 = vadd.f32 %v394_v9, %v343_v37 }
 0x198   : > { %v441_v14 = vpop.f32.mrb[2].mxu1  ;;  %v397_v15 = vpop.f32.mrb[2].mxu0 }
 0x199   : > { %v446_v17 = vrot.slane %v441_v14, 7  ;;  %v737_v18 = vpop.f32.mrb[3].mxu1  ;;  %v731_v19 = vpop.f32.mrb[3].mxu0  ;;  %v510_v45 = vadd.f32 %v509_v40, %v346_v12  ;;  %v521_v46 = vadd.f32 %v519_v41, %v397_v15 }
 0x19b   : > { %v451_v21 = vsel %vm449_vm3, %v446_v17, %v445_v16  ;;  %466 = vrot.lane.b32.xlu0 %v441_v14, %s1093_s24  ;;  %v450_v22 = vsel %vm449_vm3, %v445_v16, %v446_v17  ;;  %v511_v48 = vpack.c.bf16 %v510_v45, %v510_v45  ;;  %v522_v49 = vadd.f32 %v521_v46, %v458_v20 }
 0x19c   : > { %v452_v23 = vadd.f32 %v451_v21, %v394_v9  ;;  %v453_v24 = vadd.f32 %v450_v22, %v397_v15 }
 0x19d   : > { %v523_v52 = vpack.c.bf16 %v522_v49, %v522_v49 }
 0x19e   : > { %v460_v25 = vadd.f32 %v458_v20, %v452_v23  ;;  %v461_v26 = vadd.f32 %v458_v20, %v453_v24 }
 0x1a0   : > { %v717_v27 = vpack.c.bf16 %v460_v25, %v460_v25  ;;  %v718_v28 = vpack.c.bf16 %v461_v26, %v461_v26 }
 0x1a2   : > { %496 = vst.msk [vmem:[%s1390_s26] sm:$0xf] %vm495_vm4, %v717_v27  ;;  %497 = vst.msk [vmem:[%s1390_s26 + $0x4] sm:$0xf] %vm495_vm4, %v718_v28 }
 0x209   : > { %v465_v29 = vpop.permute.xlu0 %464 }
 0x20a   : > { %v470_v31 = vrot.slane %v465_v29, 1 }
 0x20d   : > { %v467_v30 = vpop.permute.xlu0 %466 }
 0x20e   : > { %v471_v32 = vrot.slane %v467_v30, 1 }
 0x210   : > { %v473_v33 = vsel %vm472_vm5, %v470_v31, %v471_v32  ;;  %v474_v34 = vsel %vm472_vm5, %v471_v32, %v470_v31 }
 0x211   : > { %477 = vrot.lane.b32.xlu1 %v473_v33, %s1094_s15 }
 0x215   : > { %479 = vrot.lane.b32.xlu1 %v474_v34, %s1094_s15 }
 0x283   : > { %v478_v35 = vpop.permute.xlu1 %477 }
 0x284   : > { %v483_v36 = vadd.f32 %v478_v35, %v394_v9 }
 0x286   : > { %v485_v38 = vadd.f32 %v483_v36, %v458_v20 }
 0x287   : > { %v480_v39 = vpop.permute.xlu1 %479 }
 0x288   : > { %v719_v42 = vpack.c.bf16 %v485_v38, %v485_v38  ;;  %v484_v43 = vadd.f32 %v480_v39, %v397_v15 }
 0x28a   : > { %507 = vst.msk [vmem:[%s1390_s26] sm:$0xf] %vm506_vm6, %v719_v42  ;;  %v486_v44 = vadd.f32 %v484_v43, %v458_v20 }
 0x28c   : > { %v720_v47 = vpack.c.bf16 %v486_v44, %v486_v44 }
 0x28e   : > { %508 = vst.msk [vmem:[%s1390_s26 + $0x4] sm:$0xf] %vm506_vm6, %v720_v47 }
 0x291   : > { %v515_v50 = vld [vmem:[%s1390_s26] sm:$0x1] }
 0x292   : > { %v516_v51 = vsel %vm514_vm9, %v511_v48, %v515_v50 }
 0x293   : > { %517 = vst [vmem:[%s1390_s26] sm:$0x1] %v516_v51 }
 0x295   : > { %v527_v53 = vld [vmem:[%s1390_s26 + $0x4] sm:$0x8] }
 0x296   : > { %v528_v54 = vsel %vm526_vm12, %v523_v52, %v527_v53 }
 0x297   : > { %529 = vst [vmem:[%s1390_s26 + $0x4] sm:$0x8] %v528_v54 }
 0x298   : > { %1001 = shalt.err (!%p998_p6)
}
 0x299   : > { %s1002_s11 = scalar_lea.hbm %s1406_s10, 128  ;;  %s1006_s2 = scalar_lea.hbm %s1465_s5, 256 }
 0x29a   : > { %p1003_p2 = scmp.ne.s32.totalorder %s1406_s10, %s1002_s11  ;;  %p1007_p3 = scmp.lt.u32.totalorder %s1406_s10, %s1465_s5 }
 0x29b   : > { %p1008_p11 = scmp.lt.u32.totalorder %s1006_s2, %s1002_s11  ;;  %p1010_p5 = scmp.lt.u32.totalorder %s1002_s11, %s1406_s10 }
 0x29c   : > { %p1004_p1 = pnand %p1003_p2, %p1495_p10 }
 0x29d   : > { %p1009_p0 = por %p1008_p11, %p1007_p3 }
 0x29e   : > { %p1005_p8 = pneg %p1004_p1 }
 0x29f   : > { %p1011_p13 = por %p1010_p5, %p1009_p0 }
 0x2a1   : > { %p1012_p9 = pnand %p1011_p13, %p1005_p8 }
 0x2a3   : > { %1015 = shalt.err (!%p1012_p9)
}
 0x2a4   : > { %s1096_s30 = smov 64  }
 0x2a5   : > { %754 = dma.vmem_to_hbm [thread:$0]  (%p1495_p10), %s1409_s17, 128, %s1406_s10, %s531_s0, %s1096_s30, %s1096_s30, %s1094_s15  }
 0x2a6 PF: > { %s561_s24 = sand.u32 1, %s1062_s18   ;;  %p1496_p7 = scmp.ne.s32.totalorder %s1476_s27, 0 }
 0x2a7   : > { %p1497_p12 = scmp.ge.s32.totalorder %s1082_s23, 2  ;;  %s562_s26 = scalar_lea.sflag [#allocation4], %s561_s24 }
 0x2a9   : > { %p774_p4 = pnand %p1497_p12, %p1496_p7 }
 0x2ab   : > { %1057 = dma.done.wait (!%p774_p4), %s562_s26, 128  }
 0x2ac   : > { %1059 = vsyncadd (!%p774_p4), %s562_s26, 4294967168  ;;  %s25_s23 = sadd.s32 1, %s1082_s23   ;;  %s1498_s8 = sld [smem:[#allocation17_spill]] }
 0x2ad   : > { %p22_p6 = scmp.ge.s32.totalorder %s25_s23, 4   ;;  %s1499_s18 = smov %s1066_s19 }
 0x2ae   : > { %s1500_s19 = smov %s1070_s20  ;;  %s1501_s20 = smov %s1287_s13 }
 0x2af   : > { %s1502_s21 = smov %s1078_s22  ;;  %24 = sbr.rel (!%p22_p6) target bundleno = 14 (0xe), region = 110 }
 0x2b2   : > { %s1503_s22 = smov %s1498_s8 }
 0x2b6   :  { %567 = vsyncpa [#allocation3], 1 }
 0x2b7   :  { %569 = vsyncpa [#allocation3 + $0x1], 1 }
 0x2b8   :  { %570 = vsyncpa [#allocation6], 1 }
 0x2b9   :  { %572 = vsyncpa [#allocation6 + $0x1], 1 }
 0x2ba   :  { %573 = vsyncpa [#allocation9], 1 }
 0x2bb   :  { %574 = vsyncpa [#allocation4], 1 }
 0x2bc   :  { %576 = vsyncpa [#allocation4 + $0x1], 1 }

</bundles_post_ra>
